<compile_context>
chip_gen: v7x
topology: tpu7x:2x2x1
jax: 0.10.0
libtpu: 0.0.40
codegen_flags: <defaults>
</compile_context>

<pallas_src>
import functools

import numpy as np
import jax
import jax.numpy as jnp
from jax.experimental import pallas as pl
from jax.experimental.pallas import tpu as pltpu


def _round_up(x, m):
    return (x + m - 1) // m * m


# ----------------------------------------------------------------------------
# Pallas kernel: whole forest for one batch tile.
# ----------------------------------------------------------------------------
def ndf_kernel(x_ref, w_ref, b_ref, gt_ref, bits_ref, probs_ref, out_ref, *,
               depth, tl_pad):
    # Decision layer for every tree at once.  Conv1d prologue and one-hot
    # feature masks are already folded into w_ref / b_ref.
    logits = jnp.dot(x_ref[...], w_ref[...],
                     preferred_element_type=jnp.float32) + b_ref[...]
    d = jax.nn.sigmoid(logits)                                     # (TB, TLp)

    # Stochastic routing: packed +/-1 gather matmul for all levels/trees, then
    # per-level VPU products.  The sign is folded into gt_ref, so
    #   term = d*(1-2*bit) + bit  ==  d if bit==0 else 1-d   (exact).
    dg = jnp.dot(d, gt_ref[...],
                 preferred_element_type=jnp.float32)               # (TB, depth*TLp)
    terms = dg + bits_ref[...]
    mu = terms[:, 0:tl_pad]
    for j in range(1, depth):
        mu = mu * terms[:, j * tl_pad:(j + 1) * tl_pad]            # 128-aligned views

    # Leaf mixture: probs is pre-softmaxed, pre-scaled by 1/num_trees, lane
    # padded; block-stacked rows make this matmul sum over trees implicitly.
    out_ref[...] = jnp.dot(mu, probs_ref[...],
                           preferred_element_type=jnp.float32)     # (TB, C_pad)


# ----------------------------------------------------------------------------
# Packed, sign-folded, lane-padded block-diagonal routing tables.
# (depend only on num_trees, depth and the padded tree-leaf width)
# ----------------------------------------------------------------------------
def packed_routing_tables(num_trees, depth, tl_pad):
    L = 2 ** depth
    GT = np.zeros((tl_pad, depth * tl_pad), np.float32)
    bits = np.zeros((1, depth * tl_pad), np.float32)
    for j in range(depth):
        for t in range(num_trees):
            for l in range(L):
                node = (1 << j) + (l >> (depth - j))       # decision node for leaf l
                bit = (l >> (depth - 1 - j)) & 1           # 0 -> d, 1 -> 1-d
                col = j * tl_pad + t * L + l               # level-major, 128-padded blocks
                GT[t * L + node, col] = 1.0 - 2.0 * bit    # sign folded in
                bits[0, col] = float(bit)
    # Padded lane columns stay all-zero: term = 0 there, mu = 0, and the
    # corresponding probs rows are zero, so dead lanes contribute nothing.
    return jnp.asarray(GT), jnp.asarray(bits)


# ----------------------------------------------------------------------------
# Wrapper
# ----------------------------------------------------------------------------
def ndf_forward(features, params, *, num_trees, depth, num_classes,
                batch_tile=1024):
    B = features.shape[0]
    x = features.reshape(B, -1).astype(jnp.float32)
    Fin = x.shape[1]
    Fc = (Fin - 3) // 3 + 1                      # Conv1d(k=3, s=3) output length

    L = 2 ** depth
    TL = num_trees * L
    TL_pad = _round_up(TL, 128)                  # lane-align the tree/leaf axis
    C_pad = _round_up(max(num_classes, 1), 128)  # lane-dense output stores

    # ---- offline parameter folding (pure parameter transforms) ------------
    # One-hot feature masks folded into decision weights; trees on lanes.
    w_eff = jnp.concatenate([params["maskT"][t] @ params["WT"][t]
                             for t in range(num_trees)], axis=1)    # (Fc, TL)
    b_all = jnp.concatenate([params["b"][t]
                             for t in range(num_trees)], axis=1)    # (1, TL)
    # Conv1d(1,1,k=3,s=3) folded into the decision matmul so the kernel reads
    # raw x:  W_fold[3i+k, :] = cw[k] * W_eff[i, :];  conv bias into b.
    cw = params["cw"]
    w_fold = (w_eff[:, None, :] * cw[:3][None, :, None]).reshape(3 * Fc, TL)
    w_fold = jnp.pad(w_fold, ((0, Fin - 3 * Fc), (0, TL_pad - TL)))  # (Fin, TLp)
    b_fold = b_all + cw[3] * jnp.sum(w_eff, axis=0, keepdims=True)
    b_fold = jnp.pad(b_fold, ((0, 0), (0, TL_pad - TL)))             # (1, TLp)

    # Leaf distributions: softmax + 1/num_trees prescale + zero padding.
    probs = jax.nn.softmax(params["pi"], axis=-1) / float(num_trees)  # (T, L, C)
    probs = probs.reshape(TL, num_classes)
    probs = jnp.pad(probs, ((0, TL_pad - TL), (0, C_pad - num_classes)))

    GT, bits = packed_routing_tables(num_trees, depth, TL_pad)

    # ---- batch tiling ------------------------------------------------------
    # One "parallel" grid axis; pick TB so there are >= 2 grid steps whenever
    # B allows it (v7x has 2 TensorCores), but keep tiles large so the
    # ~0.35us per-grid-step overhead stays amortized (v5e/v6e single-TC).
    B_pad = _round_up(B, 8)
    TB = min(batch_tile, max(8, _round_up(pl.cdiv(B_pad, 2), 8)))
    B_pad = _round_up(B_pad, TB)
    x = jnp.pad(x, ((0, B_pad - B), (0, 0)))

    # ---- explicit VMEM budget ---------------------------------------------
    # Resident weights: w_fold, b_fold, GT (the O(depth*TL^2) block), bits,
    # probs; activations: x tile + out tile.  The pipeline double-buffers
    # every stream, so budget 2x and cap at the smallest physical VMEM (v7x).
    weight_bytes = 4 * (Fin * TL_pad + TL_pad + TL_pad * depth * TL_pad
                        + depth * TL_pad + TL_pad * C_pad)
    act_bytes = 4 * TB * (Fin + C_pad)
    vmem_limit = int(min(64 * 1024 * 1024,
                         max(2 * (weight_bytes + act_bytes) + (4 << 20),
                             16 << 20)))
    # For much larger forests (TL >= 512): single-buffer the constant weight
    # specs (pipeline_mode=pl.Buffered(1)) or tile GT over a depth grid axis,
    # or replace the GT matmul with static VPU-side replication of d.

    kernel = functools.partial(ndf_kernel, depth=depth, tl_pad=TL_pad)

    out = pl.pallas_call(
        kernel,
        out_shape=jax.ShapeDtypeStruct((B_pad, C_pad), jnp.float32),
        grid_spec=pltpu.PrefetchScalarGridSpec(
            num_scalar_prefetch=0,
            grid=(B_pad // TB,),
            in_specs=[
                pl.BlockSpec((TB, Fin), lambda i: (i, 0)),             # raw x (batch-tiled)
                pl.BlockSpec((Fin, TL_pad), lambda i: (0, 0)),         # conv+mask-folded weights
                pl.BlockSpec((1, TL_pad), lambda i: (0, 0)),           # folded biases
                pl.BlockSpec((TL_pad, depth * TL_pad), lambda i: (0, 0)),  # sign-folded routing
                pl.BlockSpec((1, depth * TL_pad), lambda i: (0, 0)),   # bits
                pl.BlockSpec((TL_pad, C_pad), lambda i: (0, 0)),       # scaled leaf probs
            ],
            out_specs=pl.BlockSpec((TB, C_pad), lambda i: (i, 0)),
        ),
        compiler_params=pltpu.CompilerParams(
            dimension_semantics=("parallel",),
            vmem_limit_bytes=vmem_limit),
    )(x, w_fold, b_fold, GT, bits, probs)

    return out[:B, :num_classes]


# ----------------------------------------------------------------------------
# Deterministic parameter construction (matches module __init__ shapes)
# ----------------------------------------------------------------------------
def init_params(key, num_trees, depth, num_features_in, used_features_rate,
                num_classes):
    Fc = (num_features_in - 3) // 3 + 1
    L = 2 ** depth
    U = int(Fc * used_features_rate)
    keys = jax.random.split(key, 2 + num_trees)

    bound_c = 1.0 / np.sqrt(3.0)
    conv_w = jax.random.uniform(keys[0], (3,), jnp.float32, -bound_c, bound_c)
    conv_b = jax.random.uniform(keys[1], (1,), jnp.float32, -bound_c, bound_c)
    cw = jnp.concatenate([conv_w, conv_b])                             # (4,)

    maskT_all, WT_all, b_all, pi_all = [], [], [], []
    bound = 1.0 / np.sqrt(U)
    for t in range(num_trees):
        kt = jax.random.split(keys[2 + t], 4)
        idx = jax.random.permutation(kt[0], Fc)[:U]                    # sampled feature indices
        maskT = jax.nn.one_hot(idx, Fc, dtype=jnp.float32).T           # (Fc, U)
        W = jax.random.uniform(kt[1], (L, U), jnp.float32, -bound, bound)
        b = jax.random.uniform(kt[2], (L,), jnp.float32, -bound, bound)
        pi = jax.random.uniform(kt[3], (L, num_classes), jnp.float32)
        maskT_all.append(maskT)
        WT_all.append(W.T)
        b_all.append(b[None, :])
        pi_all.append(pi)

    return dict(cw=cw,
                maskT=jnp.stack(maskT_all),
                WT=jnp.stack(WT_all),
                b=jnp.stack(b_all),
                pi=jnp.stack(pi_all))


# ----------------------------------------------------------------------------
# Pure-JAX reference (mirrors the PyTorch forward exactly)
# ----------------------------------------------------------------------------
def ndf_reference(features, params, *, num_trees, depth, num_classes):
    B = features.shape[0]
    x = features.reshape(B, -1).astype(jnp.float32)
    Fin = x.shape[1]
    Fc = (Fin - 3) // 3 + 1
    cw = params["cw"]
    conv = (x[:, 0:3 * Fc:3] * cw[0] + x[:, 1:3 * Fc:3] * cw[1]
            + x[:, 2:3 * Fc:3] * cw[2] + cw[3])
    L = 2 ** depth
    out = jnp.zeros((B, num_classes), jnp.float32)
    for t in range(num_trees):
        masked = conv @ params["maskT"][t]
        logits = masked @ params["WT"][t] + params["b"][t]
        d = jax.nn.sigmoid(logits)
        dec = jnp.stack([d, 1.0 - d], axis=2)
        mu = jnp.ones((B, 1, 1), jnp.float32)
        begin, end = 1, 2
        for level in range(depth):
            mu = mu.reshape(B, -1, 1)
            mu = jnp.tile(mu, (1, 1, 2))
            mu = mu * dec[:, begin:end, :]
            begin, end = end, end + 2 ** (level + 1)
        mu = mu.reshape(B, L)
        probs = jax.nn.softmax(params["pi"][t], axis=-1)
        out = out + mu @ probs
    return out / num_trees


# ----------------------------------------------------------------------------
if __name__ == "__main__":
    B, F_IN = 8, 64
    NUM_TREES, DEPTH, USED_RATE, NUM_CLASSES = 4, 3, 0.5, 4

    key = jax.random.PRNGKey(0)
    kx, kp = jax.random.split(key)
    features = jax.random.normal(kx, (B, F_IN), dtype=jnp.float32)
    params = init_params(kp, NUM_TREES, DEPTH, F_IN, USED_RATE, NUM_CLASSES)

    out = ndf_forward(features, params, num_trees=NUM_TREES, depth=DEPTH,
                      num_classes=NUM_CLASSES)
    out = jax.block_until_ready(out)

    ref = ndf_reference(features, params, num_trees=NUM_TREES, depth=DEPTH,
                        num_classes=NUM_CLASSES)
    # Everything is f32; only benign reassociation (conv/mask folding) differs.
    np.testing.assert_allclose(np.asarray(out), np.asarray(ref),
                               rtol=1e-4, atol=2e-5)
    # Each tree emits a probability distribution, so forest output rows sum to 1.
    np.testing.assert_allclose(np.asarray(out).sum(axis=-1),
                               np.ones((B,), np.float32), atol=1e-5)
    print("KERNEL_OK")
</pallas_src>

<mosaic_0001>
module attributes {stable_mosaic.version = 11 : i64} {
  func.func @ndf_kernel(%arg0: i32, %arg1: memref<8x64xf32, #tpu.memory_space<vmem>>, %arg2: memref<64x128xf32, #tpu.memory_space<vmem>>, %arg3: memref<1x128xf32, #tpu.memory_space<vmem>>, %arg4: memref<128x384xf32, #tpu.memory_space<vmem>>, %arg5: memref<1x384xf32, #tpu.memory_space<vmem>>, %arg6: memref<128x128xf32, #tpu.memory_space<vmem>>, %arg7: memref<8x128xf32, #tpu.memory_space<vmem>>) attributes {dimension_semantics = [#tpu.dimension_semantics<parallel>], iteration_bounds = array<i64: 1>, scalar_prefetch = 0 : i64, scratch_operands = 0 : i64, tpu.core_type = #tpu.core_type<tc>, window_params = [{transform_indices = @transform_0, window_bounds = array<i64: 8, 64>}, {pipeline_mode = #tpu.pipeline_mode<synchronous>, transform_indices = @transform_1, window_bounds = array<i64: 64, 128>}, {pipeline_mode = #tpu.pipeline_mode<synchronous>, transform_indices = @transform_2, window_bounds = array<i64: 1, 128>}, {pipeline_mode = #tpu.pipeline_mode<synchronous>, transform_indices = @transform_3, window_bounds = array<i64: 128, 384>}, {pipeline_mode = #tpu.pipeline_mode<synchronous>, transform_indices = @transform_4, window_bounds = array<i64: 1, 384>}, {pipeline_mode = #tpu.pipeline_mode<synchronous>, transform_indices = @transform_5, window_bounds = array<i64: 128, 128>}, {transform_indices = @transform_6, window_bounds = array<i64: 8, 128>}]} {
    %c0 = arith.constant 0 : index
    %c0_0 = arith.constant 0 : index
    %0 = vector.load %arg1[%c0, %c0_0] : memref<8x64xf32, #tpu.memory_space<vmem>>, vector<8x64xf32>
    %c0_1 = arith.constant 0 : index
    %c0_2 = arith.constant 0 : index
    %1 = vector.load %arg2[%c0_1, %c0_2] : memref<64x128xf32, #tpu.memory_space<vmem>>, vector<64x128xf32>
    %cst = arith.constant dense<0.000000e+00> : vector<8x128xf32>
    %2 = tpu.matmul %0, %1, %cst {dimension_numbers = #tpu.dot_dimension_numbers<[1], [0], [0], [1], [0, 0, 1, 1], [], []>} : vector<8x64xf32>, vector<64x128xf32>, vector<8x128xf32> -> vector<8x128xf32>
    %c0_3 = arith.constant 0 : index
    %c0_4 = arith.constant 0 : index
    %3 = vector.load %arg3[%c0_3, %c0_4] : memref<1x128xf32, #tpu.memory_space<vmem>>, vector<1x128xf32>
    %4 = vector.broadcast %3 : vector<1x128xf32> to vector<8x128xf32>
    %5 = arith.addf %2, %4 : vector<8x128xf32>
    %6 = arith.negf %5 : vector<8x128xf32>
    %7 = math.exp %6 : vector<8x128xf32>
    %cst_5 = arith.constant 1.000000e+00 : f32
    %8 = vector.broadcast %cst_5 : f32 to vector<8x128xf32>
    %9 = arith.addf %8, %7 : vector<8x128xf32>
    %10 = arith.divf %8, %9 : vector<8x128xf32>
    %c0_6 = arith.constant 0 : index
    %c0_7 = arith.constant 0 : index
    %11 = vector.load %arg4[%c0_6, %c0_7] : memref<128x384xf32, #tpu.memory_space<vmem>>, vector<128x384xf32>
    %cst_8 = arith.constant dense<0.000000e+00> : vector<8x384xf32>
    %12 = tpu.matmul %10, %11, %cst_8 {dimension_numbers = #tpu.dot_dimension_numbers<[1], [0], [0], [1], [0, 0, 1, 1], [], []>} : vector<8x128xf32>, vector<128x384xf32>, vector<8x384xf32> -> vector<8x384xf32>
    %c0_9 = arith.constant 0 : index
    %c0_10 = arith.constant 0 : index
    %13 = vector.load %arg5[%c0_9, %c0_10] : memref<1x384xf32, #tpu.memory_space<vmem>>, vector<1x384xf32>
    %14 = vector.broadcast %13 : vector<1x384xf32> to vector<8x384xf32>
    %15 = arith.addf %12, %14 : vector<8x384xf32>
    %16 = vector.extract_strided_slice %15 {offsets = [0, 0], sizes = [8, 128], strides = [1, 1]} : vector<8x384xf32> to vector<8x128xf32>
    %17 = vector.extract_strided_slice %15 {offsets = [0, 128], sizes = [8, 128], strides = [1, 1]} : vector<8x384xf32> to vector<8x128xf32>
    %18 = arith.mulf %16, %17 : vector<8x128xf32>
    %19 = vector.extract_strided_slice %15 {offsets = [0, 256], sizes = [8, 128], strides = [1, 1]} : vector<8x384xf32> to vector<8x128xf32>
    %20 = arith.mulf %18, %19 : vector<8x128xf32>
    %c0_11 = arith.constant 0 : index
    %c0_12 = arith.constant 0 : index
    %21 = vector.load %arg6[%c0_11, %c0_12] : memref<128x128xf32, #tpu.memory_space<vmem>>, vector<128x128xf32>
    %cst_13 = arith.constant dense<0.000000e+00> : vector<8x128xf32>
    %22 = tpu.matmul %20, %21, %cst_13 {dimension_numbers = #tpu.dot_dimension_numbers<[1], [0], [0], [1], [0, 0, 1, 1], [], []>} : vector<8x128xf32>, vector<128x128xf32>, vector<8x128xf32> -> vector<8x128xf32>
    %c0_14 = arith.constant 0 : index
    %c0_15 = arith.constant 0 : index
    %23 = vector.load %arg7[%c0_14, %c0_15] : memref<8x128xf32, #tpu.memory_space<vmem>>, vector<8x128xf32>
    tpu.vector_store %arg7[%c0_14, %c0_15], %22 {strides = array<i32>} : memref<8x128xf32, #tpu.memory_space<vmem>>, vector<8x128xf32>,
    return
  }
  func.func @transform_0(%arg0: i32) -> (i32, i32) {
    %c0_i32 = arith.constant 0 : i32
    %c0_i32_0 = arith.constant 0 : i32
    return %arg0, %c0_i32 : i32, i32
  }
  func.func @transform_1(%arg0: i32) -> (i32, i32) {
    %c0_i32 = arith.constant 0 : i32
    %c0_i32_0 = arith.constant 0 : i32
    %c0_i32_1 = arith.constant 0 : i32
    return %c0_i32, %c0_i32_0 : i32, i32
  }
  func.func @transform_2(%arg0: i32) -> (i32, i32) {
    %c0_i32 = arith.constant 0 : i32
    %c0_i32_0 = arith.constant 0 : i32
    %c0_i32_1 = arith.constant 0 : i32
    return %c0_i32, %c0_i32_0 : i32, i32
  }
  func.func @transform_3(%arg0: i32) -> (i32, i32) {
    %c0_i32 = arith.constant 0 : i32
    %c0_i32_0 = arith.constant 0 : i32
    %c0_i32_1 = arith.constant 0 : i32
    return %c0_i32, %c0_i32_0 : i32, i32
  }
  func.func @transform_4(%arg0: i32) -> (i32, i32) {
    %c0_i32 = arith.constant 0 : i32
    %c0_i32_0 = arith.constant 0 : i32
    %c0_i32_1 = arith.constant 0 : i32
    return %c0_i32, %c0_i32_0 : i32, i32
  }
  func.func @transform_5(%arg0: i32) -> (i32, i32) {
    %c0_i32 = arith.constant 0 : i32
    %c0_i32_0 = arith.constant 0 : i32
    %c0_i32_1 = arith.constant 0 : i32
    return %c0_i32, %c0_i32_0 : i32, i32
  }
  func.func @transform_6(%arg0: i32) -> (i32, i32) {
    %c0_i32 = arith.constant 0 : i32
    %c0_i32_0 = arith.constant 0 : i32
    return %arg0, %c0_i32 : i32, i32
  }
}

</mosaic_0001>

<bundles_post_ra>
// kernel: tpu_custom_call.1
= control target key start
LH: loop header
LB: loop body
LE: loop exit
PB: predicated region body
PF: predicated region fallthrough
CT: control target
= control target key end

     0   :  { %11 = vsyncpa [#allocation3], 0  ;;  %s992_s0 = inlined_call_operand.hbm [shape: f32[8,64], index: 0, kind: input, shape index: {}]   ;;  %s993_s1 = inlined_call_operand.hbm [shape: f32[64,128], index: 1, kind: input, shape index: {}]   ;;  %s994_s2 = inlined_call_operand.vmem [shape: f32[1,128], index: 2, kind: input, shape index: {}]   ;;  %s995_s3 = inlined_call_operand.hbm [shape: f32[128,384], index: 3, kind: input, shape index: {}]   ;;  %s996_s4 = inlined_call_operand.vmem [shape: f32[1,384], index: 4, kind: input, shape index: {}]   ;;  %s997_s5 = inlined_call_operand.hbm [shape: f32[128,128], index: 5, kind: input, shape index: {}]   ;;  %s998_s6 = inlined_call_operand.hbm [shape: f32[8,128], index: 6, kind: output, shape index: {}]  }
   0x1   :  { %12 = vsyncpa [#allocation6], 0 }
   0x2   :  { %13 = vsyncpa [#allocation9], 0 }
   0x3   :  { %14 = vsyncpa [#allocation4], 0  ;;  %s846_s21 = smov [#allocation5]   ;;  %s728_s25 = scalar_lea.hbm %s993_s1, 1024 }
   0x4   :  { %s30_s22 = sshll.u32 %s846_s21, 4  ;;  %p729_p0 = scmp.ne.s32.totalorder %s993_s1, %s728_s25  ;;  %s31_s22 = int_to_ptr.vmem [resolvable:$true] %s30_s22 }
   0x5   :  { %p732_p1 = scmp.lt.u32.totalorder %s728_s25, %s993_s1 }
   0x7   :  { %p734_p2 = pnand %p732_p1, %p729_p0 }
   0x9   :  { %737 = shalt.err (!%p734_p2)
}
   0xa   :  { %s738_s30 = scalar_lea.vmem %s31_s22, 1024  ;;  %p743_p4 = scmp.lt.s32.totalorder %s31_s22, %s31_s22 }
   0xb   :  { %p739_p3 = scmp.ne.s32.totalorder %s31_s22, %s738_s30  ;;  %p744_p5 = scmp.lt.s32.totalorder %s738_s30, %s738_s30 }
   0xd   :  { %p745_p6 = por %p744_p5, %p743_p4 }
   0xf   :  { %p746_p7 = pnand %p745_p6, %p739_p3 }
  0x11   :  { %749 = shalt.err (!%p746_p7)
}
  0x12   :  { %s847_s7 = smov 128   ;;  %s848_s8 = smov 8  }
  0x13   :  { %36 = dma.hbm_to_vmem [thread:$0]  %s993_s1, 1024, %s31_s22, [#allocation6], %s847_s7, %s847_s7, %s848_s8  }
  0x14   :  { %s849_s11 = smov [#allocation2]   ;;  %s850_s13 = smov [#allocation7]  }
  0x15   :  { %s21_s12 = sshll.u32 %s849_s11, 4  ;;  %s44_s14 = sshll.u32 %s850_s13, 4  ;;  %s22_s12 = int_to_ptr.vmem [resolvable:$true] %s21_s12  ;;  %s45_s14 = int_to_ptr.vmem [resolvable:$true] %s44_s14 }
  0x16   :  { %s750_s17 = scalar_lea.hbm %s992_s0, 128 }
  0x17   :  { %p751_p8 = scmp.ne.s32.totalorder %s992_s0, %s750_s17  ;;  %p754_p9 = scmp.lt.u32.totalorder %s750_s17, %s992_s0 }
  0x19   :  { %p756_p10 = pnand %p754_p9, %p751_p8 }
  0x1b   :  { %759 = shalt.err (!%p756_p10)
}
  0x1c   :  { %s760_s1 = scalar_lea.vmem %s22_s12, 128  ;;  %p765_p12 = scmp.lt.s32.totalorder %s22_s12, %s22_s12 }
  0x1d   :  { %p761_p11 = scmp.ne.s32.totalorder %s22_s12, %s760_s1  ;;  %p766_p13 = scmp.lt.s32.totalorder %s760_s1, %s760_s1 }
  0x1f   :  { %p767_p0 = por %p766_p13, %p765_p12 }
  0x21   :  { %p768_p1 = pnand %p767_p0, %p761_p11 }
  0x23   :  { %771 = shalt.err (!%p768_p1)
}
  0x24   :  { %24 = dma.hbm_to_vmem [thread:$0]  %s992_s0, 128, %s22_s12, [#allocation3]  }
  0x25   :  { %s772_s26 = scalar_lea.hbm %s995_s3, 6144 }
  0x26   :  { %p773_p2 = scmp.ne.s32.totalorder %s995_s3, %s772_s26  ;;  %p776_p3 = scmp.lt.u32.totalorder %s772_s26, %s995_s3 }
  0x28   :  { %p778_p4 = pnand %p776_p3, %p773_p2 }
  0x2a   :  { %781 = shalt.err (!%p778_p4)
}
  0x2b   :  { %s782_s9 = scalar_lea.vmem %s45_s14, 6144  ;;  %p787_p6 = scmp.lt.s32.totalorder %s45_s14, %s45_s14 }
  0x2c   :  { %p783_p5 = scmp.ne.s32.totalorder %s45_s14, %s782_s9  ;;  %p788_p7 = scmp.lt.s32.totalorder %s782_s9, %s782_s9 }
  0x2e   :  { %p789_p8 = por %p788_p7, %p787_p6 }
  0x30   :  { %p790_p9 = pnand %p789_p8, %p783_p5 }
  0x32   :  { %793 = shalt.err (!%p790_p9)
}
  0x33   :  { %s851_s0 = smov 384   ;;  %s852_s10 = smov 24  }
  0x34   :  { %50 = dma.hbm_to_vmem [thread:$0]  %s995_s3, 6144, %s45_s14, [#allocation6], %s851_s0, %s851_s0, %s852_s10  }
  0x35   :  { %s853_s13 = smov [#allocation8]   ;;  %s794_s18 = scalar_lea.hbm %s997_s5, 2048 }
  0x36   :  { %s58_s15 = sshll.u32 %s853_s13, 4  ;;  %p795_p10 = scmp.ne.s32.totalorder %s997_s5, %s794_s18  ;;  %s59_s15 = int_to_ptr.vmem [resolvable:$true] %s58_s15 }
  0x37   :  { %p798_p11 = scmp.lt.u32.totalorder %s794_s18, %s997_s5 }
  0x39   :  { %p800_p12 = pnand %p798_p11, %p795_p10 }
  0x3b   :  { %803 = shalt.err (!%p800_p12)
}
  0x3c   :  { %s804_s22 = scalar_lea.vmem %s59_s15, 2048  ;;  %p809_p0 = scmp.lt.s32.totalorder %s59_s15, %s59_s15 }
  0x3d   :  { %p805_p13 = scmp.ne.s32.totalorder %s59_s15, %s804_s22  ;;  %p810_p1 = scmp.lt.s32.totalorder %s804_s22, %s804_s22 }
  0x3f   :  { %p811_p2 = por %p810_p1, %p809_p0 }
  0x41   :  { %p812_p3 = pnand %p811_p2, %p805_p13 }
  0x43   :  { %815 = shalt.err (!%p812_p3)
}
  0x44   :  { %64 = dma.hbm_to_vmem [thread:$0]  %s997_s5, 2048, %s59_s15, [#allocation9], %s847_s7, %s847_s7, %s848_s8  }
  0x45   :  { %838 = dma.done.wait [#allocation3], 128  }
  0x46   :  { %839 = vsyncadd [#allocation3], 4294967168 }
  0x47   :  { %840 = dma.done.wait [#allocation6], 7168  }
  0x48   :  { %841 = vsyncadd [#allocation6], 4294960128 }
  0x49   :  { %842 = dma.done.wait [#allocation9], 2048  }
  0x4a   :  { %843 = vsyncadd [#allocation9], 4294965248  ;;  %v854_v0 = vmov 0.0|0.0   ;;  %vm855_vm0 = vmmov 0   ;;  %v856_v1 = vmov 0.0   ;;  %v78_v2 = vld [vmem:[#allocation5] sm:$0xff] }
  0x4b   :  { %620 = vmatprep.subr.bf16.mxu0 %v854_v0  ;;  %547 = vmatprep.mubr.msk.f32.mxu0 %vm855_vm0, %v856_v1  ;;  %v79_v3 = vld [vmem:[#allocation5 + $0x8] sm:$0xff]  ;;  %v80_v4 = vld [vmem:[#allocation5 + $0x10] sm:$0xff]  ;;  %v81_v6 = vld [vmem:[#allocation5 + $0x18] sm:$0xff]  ;;  %vm93_vm1 = vcmask 523264   ;;  %s857_s23 = smov [#allocation10]  }
  0x4c   :  { %302 = vmatprep.mubr.f32.mxu1 %v856_v1  ;;  %v621_v5 = vpack.c.bf16 %v79_v3, %v78_v2  ;;  %v624_v7 = vpack.c.bf16 %v81_v6, %v80_v4  ;;  %v174_v8 = vld [vmem:[#allocation7 + $0x8] sm:$0xff]  ;;  %v177_v9 = vld [vmem:[#allocation7 + $0x20] sm:$0xff]  ;;  %v176_v14 = vld [vmem:[#allocation7 + $0x18] sm:$0xff]  ;;  %s474_s24 = sshll.u32 %s857_s23, 4  ;;  %s475_s24 = int_to_ptr.vmem [resolvable:$true] %s474_s24 }
  0x4d   :  { %v173_v10 = vld [vmem:[#allocation7] sm:$0xff]  ;;  %v83_v12 = vld [vmem:[#allocation5 + $0x28] sm:$0xff]  ;;  %v632_v13 = vpack.c.bf16 %v177_v9, %v174_v8  ;;  %v84_v17 = vld [vmem:[#allocation5 + $0x30] sm:$0xff]  ;;  %p821_p5 = scmp.lt.s32.totalorder %s475_s24, %s475_s24 }
  0x4e   :  { %622 = vmatpush3.bf16.msra.mxu0 %v621_v5  ;;  %v82_v11 = vld [vmem:[#allocation5 + $0x20] sm:$0xff]  ;;  %v634_v15 = vpack.c.bf16 %v176_v14, %v173_v10  ;;  %v85_v18 = vld [vmem:[#allocation5 + $0x38] sm:$0xff]  ;;  %v175_v20 = vld [vmem:[#allocation7 + $0x10] sm:$0xff] }
  0x4f   :  { %623 = vmatprep.subr.bf16.mxu0 %v854_v0  ;;  %633 = vmatprep.subr.bf16.mxu1 %v632_v13  ;;  %v627_v16 = vpack.c.bf16 %v83_v12, %v82_v11  ;;  %v630_v19 = vpack.c.bf16 %v85_v18, %v84_v17  ;;  %v178_v21 = vld [vmem:[#allocation7 + $0x28] sm:$0xff]  ;;  %v77_v22 = vld [vmem:[#allocation2] sm:$0xff]  ;;  %v183_v25 = vld [vmem:[#allocation7 + $0x50] sm:$0xff] }
  0x50   :  { %635 = vmatpush1.bf16.msra.mxu1 %v634_v15  ;;  %v665_v23 = vpack.c.bf16 %v178_v21, %v175_v20  ;;  %v180_v24 = vld [vmem:[#allocation7 + $0x38] sm:$0xff]  ;;  %v179_v27 = vld [vmem:[#allocation7 + $0x30] sm:$0xff]  ;;  %v182_v28 = vld [vmem:[#allocation7 + $0x48] sm:$0xff] }
  0x51   :  { %v636_v26 = vpack.c.bf16 %v183_v25, %v180_v24  ;;  %v181_v29 = vld [vmem:[#allocation7 + $0x40] sm:$0xff]  ;;  %v638_v30 = vpack.c.bf16 %v182_v28, %v179_v27  ;;  %v184_v31 = vld [vmem:[#allocation7 + $0x58] sm:$0xff]  ;;  %v186_v33 = vld [vmem:[#allocation7 + $0x68] sm:$0xff] }
  0x52   :  { %625 = vmatpush3.bf16.msra.mxu0 %v624_v7  ;;  %v668_v32 = vpack.c.bf16 %v184_v31, %v181_v29  ;;  %v189_v34 = vld [vmem:[#allocation7 + $0x80] sm:$0xff]  ;;  %v188_v37 = vld [vmem:[#allocation7 + $0x78] sm:$0xff]  ;;  %v187_v38 = vld [vmem:[#allocation7 + $0x70] sm:$0xff] }
  0x53   :  { %626 = vmatprep.subr.bf16.mxu0 %v854_v0  ;;  %637 = vmatprep.subr.bf16.mxu1 %v636_v26  ;;  %v640_v35 = vpack.c.bf16 %v189_v34, %v186_v33  ;;  %v185_v36 = vld [vmem:[#allocation7 + $0x60] sm:$0xff]  ;;  %v190_v40 = vld [vmem:[#allocation7 + $0x88] sm:$0xff]  ;;  %v192_v42 = vld [vmem:[#allocation7 + $0x98] sm:$0xff] }
  0x54   :  { %639 = vmatpush1.bf16.msra.mxu1 %v638_v30  ;;  %v642_v39 = vpack.c.bf16 %v188_v37, %v185_v36  ;;  %v671_v41 = vpack.c.bf16 %v190_v40, %v187_v38  ;;  %v195_v43 = vld [vmem:[#allocation7 + $0xb0] sm:$0xff]  ;;  %v194_v46 = vld [vmem:[#allocation7 + $0xa8] sm:$0xff]  ;;  %v193_v47 = vld [vmem:[#allocation7 + $0xa0] sm:$0xff] }
  0x55   :  { %641 = vmatprep.subr.bf16.mxu1 %v640_v35  ;;  %v644_v44 = vpack.c.bf16 %v195_v43, %v192_v42  ;;  %v191_v45 = vld [vmem:[#allocation7 + $0x90] sm:$0xff]  ;;  %v196_v49 = vld [vmem:[#allocation7 + $0xb8] sm:$0xff]  ;;  %v198_v51 = vld [vmem:[#allocation7 + $0xc8] sm:$0xff] }
  0x56   :  { %628 = vmatpush3.bf16.msra.mxu0 %v627_v16  ;;  %v646_v48 = vpack.c.bf16 %v194_v46, %v191_v45  ;;  %v674_v50 = vpack.c.bf16 %v196_v49, %v193_v47  ;;  %v201_v52 = vld [vmem:[#allocation7 + $0xe0] sm:$0xff]  ;;  %v200_v55 = vld [vmem:[#allocation7 + $0xd8] sm:$0xff]  ;;  %v199_v56 = vld [vmem:[#allocation7 + $0xd0] sm:$0xff] }
  0x57   :  { %629 = vmatprep.subr.bf16.mxu0 %v854_v0  ;;  %v648_v53 = vpack.c.bf16 %v201_v52, %v198_v51  ;;  %v197_v54 = vld [vmem:[#allocation7 + $0xc0] sm:$0xff]  ;;  %v202_v58 = vld [vmem:[#allocation7 + $0xe8] sm:$0xff]  ;;  %v204_v60 = vld [vmem:[#allocation7 + $0xf8] sm:$0xff] }
  0x58   :  { %643 = vmatpush1.bf16.msra.mxu1 %v642_v39  ;;  %v650_v57 = vpack.c.bf16 %v200_v55, %v197_v54  ;;  %v677_v59 = vpack.c.bf16 %v202_v58, %v199_v56  ;;  %v207_v61 = vld [vmem:[#allocation7 + $0x110] sm:$0xff]  ;;  %v206_v2 = vld [vmem:[#allocation7 + $0x108] sm:$0xff]  ;;  %v205_v3 = vld [vmem:[#allocation7 + $0x100] sm:$0xff]  ;;  %v223_v56 = vlaneseq }
  0x59   :  { %645 = vmatprep.subr.bf16.mxu1 %v644_v44  ;;  %v652_v62 = vpack.c.bf16 %v207_v61, %v204_v60  ;;  %v203_v63 = vld [vmem:[#allocation7 + $0xf0] sm:$0xff]  ;;  %v208_v5 = vld [vmem:[#allocation7 + $0x118] sm:$0xff]  ;;  %v210_v7 = vld [vmem:[#allocation7 + $0x128] sm:$0xff] }
  0x5a   :  { %631 = vmatpush3.bf16.msra.mxu0 %v630_v19  ;;  %v654_v4 = vpack.c.bf16 %v206_v2, %v203_v63  ;;  %v680_v6 = vpack.c.bf16 %v208_v5, %v205_v3  ;;  %v213_v8 = vld [vmem:[#allocation7 + $0x140] sm:$0xff]  ;;  %v212_v11 = vld [vmem:[#allocation7 + $0x138] sm:$0xff]  ;;  %v211_v12 = vld [vmem:[#allocation7 + $0x130] sm:$0xff] }
  0x5b   :  { %664 = vmatprep.subr.bf16.mxu0 %v854_v0  ;;  %v209_v9 = vld [vmem:[#allocation7 + $0x120] sm:$0xff]  ;;  %v656_v10 = vpack.c.bf16 %v213_v8, %v210_v7  ;;  %v214_v13 = vld [vmem:[#allocation7 + $0x148] sm:$0xff]  ;;  %v216_v16 = vld [vmem:[#allocation7 + $0x158] sm:$0xff] }
  0x5c   :  { %647 = vmatpush1.bf16.msra.mxu1 %v646_v48  ;;  %v658_v14 = vpack.c.bf16 %v212_v11, %v209_v9  ;;  %v683_v15 = vpack.c.bf16 %v214_v13, %v211_v12  ;;  %v219_v17 = vld [vmem:[#allocation7 + $0x170] sm:$0xff]  ;;  %v218_v20 = vld [vmem:[#allocation7 + $0x168] sm:$0xff]  ;;  %v217_v21 = vld [vmem:[#allocation7 + $0x160] sm:$0xff] }
  0x5d   :  { %548 = vmatmul.mubr.msk.f32.vlgmr.msra.gmra.mrb[0].mxu0 %vm93_vm1, %v77_v22  ;;  %649 = vmatprep.subr.bf16.mxu1 %v648_v53  ;;  %v215_v18 = vld [vmem:[#allocation7 + $0x150] sm:$0xff]  ;;  %v660_v19 = vpack.c.bf16 %v219_v17, %v216_v16  ;;  %v220_v22 = vld [vmem:[#allocation7 + $0x178] sm:$0xff]  ;;  %v382_v33 = vld [vmem:[#allocation8 + $0x8] sm:$0xff] }
  0x5e   :  { %666 = vmatpush3.bf16.msra.mxu0 %v665_v23  ;;  %582 = vmatprep.mubr.msk.f32.mxu0 %vm855_vm0, %v856_v1  ;;  %v662_v23 = vpack.c.bf16 %v218_v20, %v215_v18  ;;  %v686_v24 = vpack.c.bf16 %v220_v22, %v217_v21  ;;  %v485_v25 = vld [vmem:[%s994_s2] ss:$0 sm:$0xff]  ;;  %v383_v35 = vld [vmem:[#allocation8 + $0x10] sm:$0xff]  ;;  %v385_v39 = vld [vmem:[#allocation8 + $0x20] sm:$0xff] }
  0x5f   :  { %667 = vmatprep.subr.bf16.mxu0 %v854_v0  ;;  %v384_v36 = vld [vmem:[#allocation8 + $0x18] sm:$0xff]  ;;  %v386_v40 = vld [vmem:[#allocation8 + $0x28] sm:$0xff]  ;;  %v387_v42 = vld [vmem:[#allocation8 + $0x30] sm:$0xff] }
  0x60   :  { %651 = vmatpush1.bf16.msra.mxu1 %v650_v57  ;;  %v692_v38 = vpack.c.bf16 %v384_v36, %v383_v35  ;;  %v388_v43 = vld [vmem:[#allocation8 + $0x38] sm:$0xff]  ;;  %v389_v45 = vld [vmem:[#allocation8 + $0x40] sm:$0xff]  ;;  %v390_v46 = vld [vmem:[#allocation8 + $0x48] sm:$0xff]  ;;  %v224_v57 = vshrl.u32 %v223_v56, 7 }
  0x61   :  { %653 = vmatprep.subr.bf16.mxu1 %v652_v62  ;;  %v698_v44 = vpack.c.bf16 %v388_v43, %v387_v42  ;;  %v701_v47 = vpack.c.bf16 %v390_v46, %v389_v45  ;;  %v392_v48 = vld [vmem:[#allocation8 + $0x58] sm:$0xff]  ;;  %v394_v51 = vld [vmem:[#allocation8 + $0x68] sm:$0xff]  ;;  %v395_v53 = vld [vmem:[#allocation8 + $0x70] sm:$0xff] }
  0x62   :  { %669 = vmatpush3.bf16.msra.mxu0 %v668_v32  ;;  %v381_v32 = vld [vmem:[#allocation8] sm:$0xff]  ;;  %v396_v54 = vld [vmem:[#allocation8 + $0x78] sm:$0xff]  ;;  %v225_v58 = vsub.s32 0, %v224_v57  ;;  %v229_v60 = vsub.s32 1, %v224_v57  ;;  %v233_v61 = vsub.s32 2, %v224_v57 }
  0x63   :  { %670 = vmatprep.subr.bf16.mxu0 %v854_v0  ;;  %v689_v34 = vpack.c.bf16 %v382_v33, %v381_v32  ;;  %v710_v55 = vpack.c.bf16 %v396_v54, %v395_v53 }
  0x64   :  { %655 = vmatpush1.bf16.msra.mxu1 %v654_v4 }
  0x65   :  { %657 = vmatprep.subr.bf16.mxu1 %v656_v10 }
  0x66   :  { %672 = vmatpush3.bf16.msra.mxu0 %v671_v41  ;;  %v695_v41 = vpack.c.bf16 %v386_v40, %v385_v39 }
  0x67   :  { %673 = vmatprep.subr.bf16.mxu0 %v854_v0 }
  0x68   :  { %659 = vmatpush1.bf16.msra.mxu1 %v658_v14 }
  0x69   :  { %661 = vmatprep.subr.bf16.mxu1 %v660_v19 }
  0x6a   :  { %675 = vmatpush3.bf16.msra.mxu0 %v674_v50  ;;  %v393_v50 = vld [vmem:[#allocation8 + $0x60] sm:$0xff] }
  0x6b   :  { %676 = vmatprep.subr.bf16.mxu0 %v854_v0  ;;  %v707_v52 = vpack.c.bf16 %v394_v51, %v393_v50 }
  0x6c   :  { %663 = vmatpush1.bf16.msra.mxu1 %v662_v23 }
  0x6d   :  { %688 = vmatprep.subr.bf16.mxu1 %v854_v0 }
  0x6e   :  { %678 = vmatpush3.bf16.msra.mxu0 %v677_v59  ;;  %v221_v59 = vld [vmem:[%s996_s4] sm:$0x7]  ;;  %s816_s4 = scalar_lea.vmem %s475_s24, 128 }
  0x6f   :  { %679 = vmatprep.subr.bf16.mxu0 %v854_v0  ;;  %v226_v62 = vrot.slane %v221_v59, %v225_v58  ;;  %v230_v63 = vrot.slane %v221_v59, %v229_v60  ;;  %v234_v3 = vrot.slane %v221_v59, %v233_v61  ;;  %p817_p4 = scmp.ne.s32.totalorder %s475_s24, %s816_s4  ;;  %p822_p6 = scmp.lt.s32.totalorder %s816_s4, %s816_s4 }
  0x71   :  { %p823_p7 = por %p822_p6, %p821_p5 }
  0x72   :  { %681 = vmatpush3.bf16.msra.mxu0 %v680_v6 }
  0x73   :  { %682 = vmatprep.subr.bf16.mxu0 %v854_v0  ;;  %p824_p8 = pnand %p823_p7, %p817_p4 }
  0x76   :  { %684 = vmatpush3.bf16.msra.mxu0 %v683_v15 }
  0x77   :  { %685 = vmatprep.subr.bf16.mxu0 %v854_v0 }
  0x7a   :  { %687 = vmatpush3.bf16.msra.mxu0 %v686_v24 }
 0x130   :  { %v163_v26 = vpop.f32.mrb[0].mxu0 }
 0x131   :  { %v164_v27 = vadd.f32 %v485_v25, %v163_v26  ;;  %v549_v28 = vpop.f32.mrb[1].mxu0 }
 0x133   :  { %v487_v29 = vmul.f32 -1.442695, %v164_v27 }
 0x135   :  { %724 = vpow2.f32 %v487_v29 }
 0x13f   :  { %v725_v30 = vpop.eup %724 }
 0x140   :  { %v170_v31 = vadd.f32 1.0, %v725_v30 }
 0x142   :  { %726 = vrcp.f32 %v170_v31 }
 0x14c   :  { %v727_v37 = vpop.eup %726 }
 0x14d   :  { %303 = vmatmul.mubr.f32.vlgmr.msra.gmra.mrb[0].mxu1 %v727_v37  ;;  %583 = vmatmul.mubr.f32.vlgmr.msra.gmra.mrb[2].mxu0 %v727_v37 }
 0x14e   :  { %690 = vmatpush3.bf16.msra.mxu1 %v689_v34  ;;  %617 = vmatprep.mubr.msk.f32.mxu1 %vm855_vm0, %v856_v1  ;;  %v391_v1 = vld [vmem:[#allocation8 + $0x50] sm:$0xff] }
 0x14f   :  { %691 = vmatprep.subr.bf16.mxu1 %v854_v0  ;;  %v704_v49 = vpack.c.bf16 %v392_v48, %v391_v1 }
 0x152   :  { %693 = vmatpush3.bf16.msra.mxu1 %v692_v38 }
 0x153   :  { %694 = vmatprep.subr.bf16.mxu1 %v854_v0 }
 0x156   :  { %696 = vmatpush3.bf16.msra.mxu1 %v695_v41 }
 0x157   :  { %697 = vmatprep.subr.bf16.mxu1 %v854_v0 }
 0x15a   :  { %699 = vmatpush3.bf16.msra.mxu1 %v698_v44 }
 0x15b   :  { %700 = vmatprep.subr.bf16.mxu1 %v854_v0 }
 0x15e   :  { %702 = vmatpush3.bf16.msra.mxu1 %v701_v47 }
 0x15f   :  { %703 = vmatprep.subr.bf16.mxu1 %v854_v0 }
 0x162   :  { %705 = vmatpush3.bf16.msra.mxu1 %v704_v49 }
 0x163   :  { %706 = vmatprep.subr.bf16.mxu1 %v854_v0 }
 0x166   :  { %708 = vmatpush3.bf16.msra.mxu1 %v707_v52 }
 0x167   :  { %709 = vmatprep.subr.bf16.mxu1 %v854_v0 }
 0x16a   :  { %711 = vmatpush3.bf16.msra.mxu1 %v710_v55 }
 0x220   :  { %v304_v2 = vpop.f32.mrb[0].mxu1  ;;  %v375_v4 = vpop.f32.mrb[2].mxu0 }
 0x221   :  { %v305_v5 = vadd.f32 %v304_v2, %v226_v62  ;;  %v306_v0 = vpop.f32.mrb[1].mxu1  ;;  %v584_v6 = vpop.f32.mrb[3].mxu0  ;;  %v376_v8 = vadd.f32 %v375_v4, %v234_v3 }
 0x222   :  { %v307_v7 = vadd.f32 %v306_v0, %v230_v63 }
 0x224   :  { %v379_v9 = vmul.f32 %v307_v7, %v305_v5 }
 0x226   :  { %v380_v10 = vmul.f32 %v379_v9, %v376_v8 }
 0x228   :  { %618 = vmatmul.mubr.f32.vlgmr.msra.gmra.mrb[2].mxu1 %v380_v10 }
 0x2fb   :  { %v463_v11 = vpop.f32.mrb[2].mxu1 }
 0x2fc   :  { %467 = vst [vmem:[#allocation10] sm:$0xff] %v463_v11  ;;  %v619_v12 = vpop.f32.mrb[3].mxu1 }
 0x2fd   :  { %827 = shalt.err (!%p824_p8)
}
 0x2fe   :  { %s828_s27 = scalar_lea.hbm %s998_s6, 128 }
 0x2ff   :  { %p829_p9 = scmp.ne.s32.totalorder %s998_s6, %s828_s27  ;;  %p832_p10 = scmp.lt.u32.totalorder %s828_s27, %s998_s6 }
 0x301   :  { %p834_p11 = pnand %p832_p10, %p829_p9 }
 0x303   :  { %837 = shalt.err (!%p834_p11)
}
 0x304   :  { %477 = dma.vmem_to_hbm [thread:$0]  %s475_s24, 128, %s998_s6, [#allocation4]  }
 0x305   :  { %844 = dma.done.wait [#allocation4], 128  }
 0x306   :  { %845 = vsyncadd [#allocation4], 4294967168 }
 0x307   :  { %481 = vsyncpa [#allocation3], 1 }
 0x308   :  { %482 = vsyncpa [#allocation6], 1 }
 0x309   :  { %483 = vsyncpa [#allocation9], 1 }
 0x30a   :  { %484 = vsyncpa [#allocation4], 1 }

</bundles_post_ra>
